<compile_context>
chip_gen: v5e
topology: v5e:2x2
jax: 0.10.0
libtpu: 0.0.40
codegen_flags: <defaults>
</compile_context>

<pallas_src>
import functools

import jax
import jax.numpy as jnp
from jax.experimental import pallas as pl
from jax.experimental.pallas import tpu as pltpu

LANES = 128          # vreg lane width
SUBLANES = 8         # vreg sublane count (f32)
BLOCK_ROWS = 1024    # rows of 128 lanes per grid step (512 KiB f32 per input)


def _mse_logits_block_kernel(pred_ref, true_ref, out_ref, *, ragged_rows):
    """One (BLOCK_ROWS, 128) tile -> (8, 128) partial sum of squared errors."""
    p = pred_ref[...].astype(jnp.float32)
    t = true_ref[...].astype(jnp.float32)
    d = jax.nn.sigmoid(p) - t          # sigmoid on EUP, sub/mul on VPU
    sq = d * d

    block_rows = sq.shape[0]

    def _reduce_to_vreg(vals):
        # (block_rows, 128) -> (8, 128): pure vector adds, no cross-lane work.
        return vals.reshape(block_rows // SUBLANES, SUBLANES, LANES).sum(axis=0)

    if ragged_rows:
        # Only the final block contains out-of-bounds (undefined) rows; mask
        # them there and nowhere else.
        i = pl.program_id(0)
        last = pl.num_programs(0) - 1

        @pl.when(i != last)
        def _():
            out_ref[...] = _reduce_to_vreg(sq)

        @pl.when(i == last)
        def _():
            row_ids = jax.lax.broadcasted_iota(jnp.int32, sq.shape, 0)
            out_ref[...] = _reduce_to_vreg(
                jnp.where(row_ids < ragged_rows, sq, jnp.float32(0.0)))
    else:
        out_ref[...] = _reduce_to_vreg(sq)


def _mse_logits_small_kernel(pred_ref, true_ref, out_ref, *, denom):
    """Whole (rows, 128) problem in a single block -> scalar mean."""
    p = pred_ref[...].astype(jnp.float32)
    t = true_ref[...].astype(jnp.float32)
    d = jax.nn.sigmoid(p) - t
    out_ref[0, 0] = jnp.sum(d * d) / jnp.float32(denom)


def mse_with_logits_loss(y_pred: jax.Array, y_true: jax.Array) -> jax.Array:
    """Scalar MSE between sigmoid(y_pred) and y_true, mean over all elements."""
    assert y_pred.shape == y_true.shape
    n = int(y_pred.size)

    pred_flat = y_pred.reshape(-1)
    true_flat = y_true.reshape(-1)

    # Pad only the ragged tail to the next multiple of 128 lanes, with neutral
    # values: sigmoid(0) - 0.5 == 0, so padded elements contribute nothing.
    lane_pad = (-n) % LANES
    if lane_pad:
        pred_flat = jnp.pad(pred_flat, (0, lane_pad))
        true_flat = jnp.pad(true_flat, (0, lane_pad), constant_values=0.5)
    rows = (n + lane_pad) // LANES

    pred_2d = pred_flat.reshape(rows, LANES)
    true_2d = true_flat.reshape(rows, LANES)

    if rows <= BLOCK_ROWS:
        # Single block covers everything: compute the scalar directly.
        kernel = functools.partial(_mse_logits_small_kernel, denom=n)
        out = pl.pallas_call(
            kernel,
            out_shape=jax.ShapeDtypeStruct((1, 1), jnp.float32),
            grid_spec=pltpu.PrefetchScalarGridSpec(
                num_scalar_prefetch=0,
                grid=(1,),
                in_specs=[
                    pl.BlockSpec((rows, LANES), lambda i: (0, 0)),
                    pl.BlockSpec((rows, LANES), lambda i: (0, 0)),
                ],
                out_specs=pl.BlockSpec(memory_space=pltpu.SMEM),
            ),
            compiler_params=pltpu.CompilerParams(
                dimension_semantics=("arbitrary",)),
        )(pred_2d, true_2d)
        return out[0, 0]

    nblocks = pl.cdiv(rows, BLOCK_ROWS)
    ragged_rows = rows % BLOCK_ROWS     # valid rows in final block (0 => full)

    kernel = functools.partial(_mse_logits_block_kernel, ragged_rows=ragged_rows)
    partials = pl.pallas_call(
        kernel,
        out_shape=jax.ShapeDtypeStruct((nblocks * SUBLANES, LANES), jnp.float32),
        grid_spec=pltpu.PrefetchScalarGridSpec(
            num_scalar_prefetch=0,
            grid=(nblocks,),
            in_specs=[
                pl.BlockSpec((BLOCK_ROWS, LANES), lambda i: (i, 0)),
                pl.BlockSpec((BLOCK_ROWS, LANES), lambda i: (i, 0)),
            ],
            out_specs=pl.BlockSpec((SUBLANES, LANES), lambda i: (i, 0)),
        ),
        compiler_params=pltpu.CompilerParams(
            # No carried accumulator -> fully parallel grid; on v7x this shards
            # the row-blocks across both TensorCores.
            dimension_semantics=("parallel",)),
    )(pred_2d, true_2d)

    # Tiny final reduction (nblocks * 8 * 128 f32) + mean, done in XLA.
    return jnp.sum(partials) / jnp.float32(n)


if __name__ == "__main__":
    key = jax.random.PRNGKey(0)

    def ref_loss(y_pred, y_true):
        return jnp.mean((jax.nn.sigmoid(y_pred) - y_true) ** 2)

    def check(shape, k):
        k1, k2 = jax.random.split(k)
        y_pred = jax.random.normal(k1, shape, dtype=jnp.float32)   # logits
        y_true = jax.random.uniform(k2, shape, dtype=jnp.float32)  # targets in [0, 1)
        got = jax.block_until_ready(mse_with_logits_loss(y_pred, y_true))
        want = ref_loss(y_pred, y_true)
        assert jnp.allclose(got, want, rtol=1e-5, atol=1e-6), (shape, got, want)

    keys = jax.random.split(key, 3)
    # Small NCHW logits/targets: single-block fast path.
    check((2, 4, 16, 16), keys[0])
    # Element count not a multiple of 128: neutral-padded lane tail.
    check((2, 3, 10, 10), keys[1])
    # Multi-block (parallel grid) path with a ragged final block.
    check((2, 4, 150, 128), keys[2])

    print("KERNEL_OK")
</pallas_src>

<mosaic_0001>
module attributes {stable_mosaic.version = 11 : i64} {
  func.func @_mse_logits_small_kernel(%arg0: i32, %arg1: memref<16x128xf32, #tpu.memory_space<vmem>>, %arg2: memref<16x128xf32, #tpu.memory_space<vmem>>, %arg3: memref<1x1xf32, #tpu.memory_space<smem>>) attributes {dimension_semantics = [#tpu.dimension_semantics<arbitrary>], iteration_bounds = array<i64: 1>, scalar_prefetch = 0 : i64, scratch_operands = 0 : i64, tpu.core_type = #tpu.core_type<tc>, window_params = [{pipeline_mode = #tpu.pipeline_mode<synchronous>, transform_indices = @transform_0, window_bounds = array<i64: 16, 128>}, {pipeline_mode = #tpu.pipeline_mode<synchronous>, transform_indices = @transform_1, window_bounds = array<i64: 16, 128>}, {transform_indices = @transform_2, window_bounds = array<i64: 1, 1>}]} {
    %c0 = arith.constant 0 : index
    %c0_0 = arith.constant 0 : index
    %0 = vector.load %arg1[%c0, %c0_0] : memref<16x128xf32, #tpu.memory_space<vmem>>, vector<16x128xf32>
    %c0_1 = arith.constant 0 : index
    %c0_2 = arith.constant 0 : index
    %1 = vector.load %arg2[%c0_1, %c0_2] : memref<16x128xf32, #tpu.memory_space<vmem>>, vector<16x128xf32>
    %2 = arith.negf %0 : vector<16x128xf32>
    %3 = math.exp %2 : vector<16x128xf32>
    %cst = arith.constant 1.000000e+00 : f32
    %4 = vector.broadcast %cst : f32 to vector<16x128xf32>
    %5 = arith.addf %4, %3 : vector<16x128xf32>
    %6 = arith.divf %4, %5 : vector<16x128xf32>
    %7 = arith.subf %6, %1 : vector<16x128xf32>
    %8 = arith.mulf %7, %7 : vector<16x128xf32>
    %9 = vector.shape_cast %8 : vector<16x128xf32> to vector<1x16x128xf32>
    %cst_3 = arith.constant dense<0.000000e+00> : vector<1xf32>
    %10 = vector.multi_reduction <add>, %9, %cst_3 [1, 2] : vector<1x16x128xf32> to vector<1xf32>
    %11 = vector.shape_cast %10 : vector<1xf32> to vector<1x1x1xf32>
    %12 = vector.extract %11[0, 0, 0] : f32 from vector<1x1x1xf32>
    %cst_4 = arith.constant 2.048000e+03 : f32
    %13 = arith.divf %12, %cst_4 : f32
    %c0_5 = arith.constant 0 : index
    %c0_6 = arith.constant 0 : index
    %14 = memref.load %arg3[%c0_5, %c0_6] : memref<1x1xf32, #tpu.memory_space<smem>>
    memref.store %13, %arg3[%c0_5, %c0_6] : memref<1x1xf32, #tpu.memory_space<smem>>
    return
  }
  func.func @transform_0(%arg0: i32) -> (i32, i32) {
    %c0_i32 = arith.constant 0 : i32
    %c0_i32_0 = arith.constant 0 : i32
    %c0_i32_1 = arith.constant 0 : i32
    return %c0_i32, %c0_i32_0 : i32, i32
  }
  func.func @transform_1(%arg0: i32) -> (i32, i32) {
    %c0_i32 = arith.constant 0 : i32
    %c0_i32_0 = arith.constant 0 : i32
    %c0_i32_1 = arith.constant 0 : i32
    return %c0_i32, %c0_i32_0 : i32, i32
  }
  func.func @transform_2(%arg0: i32) -> (i32, i32) {
    %c0_i32 = arith.constant 0 : i32
    %c0_i32_0 = arith.constant 0 : i32
    %c0_i32_1 = arith.constant 0 : i32
    return %c0_i32, %c0_i32_0 : i32, i32
  }
}

</mosaic_0001>

<bundles_post_ra>
// kernel: tpu_custom_call.1
= control target key start
LH: loop header
LB: loop body
LE: loop exit
PB: predicated region body
PF: predicated region fallthrough
CT: control target
= control target key end

     0   :  { %7 = vsyncpa [#allocation3], 0  ;;  %s246_s0 = inlined_call_operand.hbm [shape: f32[16,128], index: 0, kind: input, shape index: {}]   ;;  %s247_s1 = inlined_call_operand.hbm [shape: f32[16,128], index: 1, kind: input, shape index: {}]   ;;  %s248_s2 = inlined_call_operand.hbm [shape: f32[1,1], index: 2, kind: output, shape index: {}]  }
   0x1   :  { %8 = vsyncpa [#allocation6], 0 }
   0x2   :  { %9 = vsyncpa [#allocation4], 0  ;;  %s14_s11 = sshll.u32 %s246_s0, 4  ;;  %s216_s12 = smov [#allocation2]   ;;  %s15_s11 = int_to_ptr.hbm [resolvable:$true] %s14_s11 }
   0x3   :  { %s16_s13 = sshll.u32 %s216_s12, 4  ;;  %s27_s16 = sshll.u32 %s247_s1, 4  ;;  %s17_s13 = int_to_ptr.vmem [resolvable:$true] %s16_s13  ;;  %s28_s16 = int_to_ptr.hbm [resolvable:$true] %s27_s16 }
   0x4   :  { %s217_s17 = smov 128   ;;  %s218_s18 = smov 8  }
   0x5   :  { %22 = dma.hbm_to_vmem [thread:$0]  %s15_s11, 256, %s17_s13, [#allocation3], %s217_s17, %s217_s17, %s218_s18  }
   0x6   :  { %s219_s19 = smov [#allocation5]  }
   0x7   :  { %s29_s20 = sshll.u32 %s219_s19, 4  ;;  %s30_s20 = int_to_ptr.vmem [resolvable:$true] %s29_s20 }
   0x8   :  { %35 = dma.hbm_to_vmem [thread:$0]  %s28_s16, 256, %s30_s20, [#allocation6], %s217_s17, %s217_s17, %s218_s18  }
   0x9   :  { %210 = dma.done.wait [#allocation3], 256  }
   0xa   :  { %211 = vsyncadd [#allocation3], 4294967040 }
   0xb   :  { %212 = dma.done.wait [#allocation6], 256  }
   0xc   :  { %213 = vsyncadd [#allocation6], 4294967040  ;;  %v44_v0 = vld [vmem:[#allocation2] sm:$0xff]  ;;  %v45_v1 = vld [vmem:[#allocation2 + $0x8] sm:$0xff]  ;;  %v220_v35 = vmov 2048.0   ;;  %s116_s21 = sshll.u32 %s248_s2, 4  ;;  %s117_s21 = int_to_ptr.hbm [resolvable:$true] %s116_s21 }
   0xd   :  { %v128_v2 = vmul.f32 -1.442695, %v44_v0  ;;  %v129_v3 = vmul.f32 -1.442695, %v45_v1  ;;  %v46_v23 = vld [vmem:[#allocation5] sm:$0xff]  ;;  %v47_v25 = vld [vmem:[#allocation5 + $0x8] sm:$0xff] }
   0xe   :  { %s221_s25 = smov [#allocation7]  }
   0xf   :  { %140 = vpow2.f32 %v128_v2 }
  0x10   :  { %142 = vpow2.f32 %v129_v3 }
  0x15   :  { %v141_v4 = vpop.eup %140 }
  0x16   :  { %v143_v5 = vpop.eup %142  ;;  %v54_v6 = vadd.f32 1.0, %v141_v4 }
  0x17   :  { %v55_v7 = vadd.f32 1.0, %v143_v5 }
  0x18   :  { %144 = vrcp.f32 %v54_v6  ;;  %vm61_vm0 = vweird.f32 %v54_v6  ;;  %v67_v11 = vand.u32 2147483648, %v54_v6  ;;  %v65_v14 = vand.u32 2147483647, %v54_v6 }
  0x19   :  { %146 = vrcp.f32 %v55_v7  ;;  %v82_v15 = vand.u32 2147483648, %v55_v7  ;;  %vm76_vm2 = vweird.f32 %v55_v7  ;;  %v80_v17 = vand.u32 2147483647, %v55_v7 }
  0x1a   :  { %v68_v19 = vor.u32 1.1754944e-38, %v67_v11  ;;  %vm66_vm5 = vcmp.eq.f32.partialorder %v65_v14, 8.507059e+37  ;;  %148 = vrcp.f32 %v220_v35 }
  0x1b   :  { %v83_v22 = vor.u32 1.1754944e-38, %v82_v15  ;;  %vm81_vm7 = vcmp.eq.f32.partialorder %v80_v17, 8.507059e+37 }
  0x1e   :  { %v145_v8 = vpop.eup %144 }
  0x1f   :  { %v147_v9 = vpop.eup %146  ;;  %v57_v10 = vmul.f32 %v145_v8, %v54_v6  ;;  %vm62_vm1 = vweird.f32 %v145_v8 }
  0x20   :  { %v72_v12 = vmul.f32 %v147_v9, %v55_v7  ;;  %vm77_vm3 = vweird.f32 %v147_v9  ;;  %vm63_vm4 = vmor %vm61_vm0, %vm62_vm1  ;;  %v149_v36 = vpop.eup %148 }
  0x21   :  { %v58_v13 = vsub.f32 1.0, %v57_v10  ;;  %vm78_vm6 = vmor %vm76_vm2, %vm77_vm3  ;;  %v101_v37 = vmul.f32 2048.0, %v149_v36  ;;  %vm105_vm8 = vweird.f32 %v149_v36 }
  0x22   :  { %v73_v16 = vsub.f32 1.0, %v72_v12 }
  0x23   :  { %v59_v18 = vmul.f32 %v145_v8, %v58_v13  ;;  %v102_v38 = vsub.f32 1.0, %v101_v37 }
  0x24   :  { %v74_v20 = vmul.f32 %v147_v9, %v73_v16 }
  0x25   :  { %v60_v21 = vadd.f32 %v145_v8, %v59_v18  ;;  %v103_v42 = vmul.f32 %v149_v36, %v102_v38 }
  0x26   :  { %v75_v24 = vadd.f32 %v147_v9, %v74_v20 }
  0x27   :  { %v64_v26 = vsel %vm63_vm4, %v145_v8, %v60_v21  ;;  %v104_v45 = vadd.f32 %v149_v36, %v103_v42 }
  0x28   :  { %v69_v27 = vsel %vm66_vm5, %v68_v19, %v64_v26  ;;  %v79_v28 = vsel %vm78_vm6, %v147_v9, %v75_v24 }
  0x29   :  { %v84_v29 = vsel %vm81_vm7, %v83_v22, %v79_v28  ;;  %v86_v30 = vsub.f32 %v69_v27, %v46_v23  ;;  %v106_v48 = vsel %vm105_vm8, %v149_v36, %v104_v45 }
  0x2a   :  { %v87_v31 = vsub.f32 %v84_v29, %v47_v25 }
  0x2b   :  { %v88_v32 = vmul.f32 %v86_v30, %v86_v30 }
  0x2c   :  { %v89_v33 = vmul.f32 %v87_v31, %v87_v31 }
  0x2e   :  { %v90_v34 = vadd.f32 %v89_v33, %v88_v32 }
  0x30   :  { %91 = vadd.xlane.f32.xlu0 %v90_v34 }
  0xa3   :  { %v92_v39 = vpop.xlane.xlu0 %91 }
  0xa4   :  { %v93_v40 = vrot.slane %v92_v39, 4 }
  0xa6   :  { %v94_v41 = vadd.f32 %v93_v40, %v92_v39 }
  0xa8   :  { %v95_v43 = vrot.slane %v94_v41, 2 }
  0xaa   :  { %v96_v44 = vadd.f32 %v95_v43, %v94_v41 }
  0xac   :  { %v97_v46 = vrot.slane %v96_v44, 1 }
  0xae   :  { %v98_v47 = vadd.f32 %v97_v46, %v96_v44 }
  0xb0   :  { %130 = vpush %v98_v47 }
  0xb1   :  { %132 = vpush %v106_v48 }
  0xe1   :  { %s131_s22 = spop %130 }
  0xe2   :  { %s133_s23 = spop %132 }
  0xe3   :  { %s108_s24 = smul.f32 %s133_s23, %s131_s22 }
  0xe5   :  { %110 = sst [smem:[#allocation7]] %s108_s24 }
  0xe6   :  { %119 = dma.smem_to_hbm %s221_s25, 16, %s117_s21, [#allocation4]  }
  0xe7   :  { %214 = dma.done.wait [#allocation4], 16  }
  0xe8   :  { %215 = vsyncadd [#allocation4], 4294967280 }
  0xe9   :  { %124 = sfence }
  0xea   :  { %125 = vsyncpa [#allocation3], 1 }
  0xeb   :  { %126 = vsyncpa [#allocation6], 1 }
  0xec   :  { %127 = vsyncpa [#allocation4], 1 }

</bundles_post_ra>
